<compile_context>
chip_gen: v5e
topology: v5e:2x2
jax: 0.10.0
libtpu: 0.0.40
codegen_flags: <defaults>
</compile_context>

<pallas_src>
import jax
import jax.numpy as jnp
from jax.experimental import pallas as pl
from jax.experimental.pallas import tpu as pltpu

INPUT_DIM = 784
MID_DIM = 100
OUTPUT_DIM = 7

MID_PAD = 128   # hidden lanes (100 -> 128); pads are exact zeros
OUT_PAD = 128   # logit lanes (7 -> 128); keeps output stores lane-dense

NEG_BIG = -1.0e30   # finite "-inf" for padded logit lanes; MUST stay float32

BLOCK_B_CAP = 1024  # rows per grid step: x 2x1024x784 + out 2x1024x128 +
                    # weights ~ 8.5 MiB f32 / ~5 MiB bf16 -> fits v5e's
                    # 16 MiB scoped-VMEM default (and v6e/v7x easily)


def _round_up(x, m):
    return (x + m - 1) // m * m


def _choose_block_b(B, cap=BLOCK_B_CAP):
    b8 = _round_up(max(B, 1), 8)
    n_steps = (b8 + cap - 1) // cap
    if n_steps < 2 and b8 > 8:
        n_steps = 2   # >= 2 grid steps so v7x megacore can shard the batch
    n_steps = max(n_steps, 1)
    return _round_up((b8 + n_steps - 1) // n_steps, 8)


def mnist_kernel(x_ref, w1_ref, b1_ref, w2_ref, b2_ref, o_ref):
    # fc1 (MXU, f32 accumulate) + bias + relu; hidden pad lanes stay exact 0.
    h = jnp.dot(x_ref[...], w1_ref[...], preferred_element_type=jnp.float32)
    h = jnp.maximum(h + b1_ref[...], 0.0)
    # Dropout(p=0.4) is identity in eval mode.
    # TODO(synk): training-mode dropout (pltpu.prng_seed + prng_random_bits
    # mask) is not implemented.
    logits = jnp.dot(h.astype(w2_ref.dtype), w2_ref[...],
                     preferred_element_type=jnp.float32)
    logits = logits + b2_ref[...]           # padded lanes get NEG_BIG (f32)
    # log_softmax over the 128 lanes; padded lanes contribute exp(NEG_BIG)=0,
    # so the real 7 columns are numerically unchanged.
    m = jnp.max(logits, axis=-1, keepdims=True)
    shifted = logits - m
    lse = jnp.log(jnp.sum(jnp.exp(shifted), axis=-1, keepdims=True))
    o_ref[...] = (shifted - lse).astype(o_ref.dtype)


def mnist_forward(x, w1, b1, w2, b2, *, block_b=None, use_bf16=True):
    """x: (B, ...) with prod(...)==784. Returns (B, 7) float32 log-probs."""
    B = x.shape[0]
    in_dt = jnp.bfloat16 if use_bf16 else jnp.float32

    # One fused pass over x: flatten + cast. No feature-dim padding -- a
    # BlockSpec last dim equal to the full array dim (784) is legal and the
    # MXU handles K=784 directly.
    x2d = x.reshape(B, -1).astype(in_dt)
    assert x2d.shape[1] == INPUT_DIM

    # Small, one-time weight/bias padding to lane-dense shapes (cast before
    # padding so the padded copies are already half-size in bf16).
    w1p = jnp.pad(w1.astype(in_dt), ((0, 0), (0, MID_PAD - MID_DIM)))
    b1p = jnp.pad(b1.astype(jnp.float32).reshape(1, MID_DIM),
                  ((0, 0), (0, MID_PAD - MID_DIM)))
    w2p = jnp.pad(w2.astype(in_dt),
                  ((0, MID_PAD - MID_DIM), (0, OUT_PAD - OUTPUT_DIM)))
    b2p = jnp.pad(b2.astype(jnp.float32).reshape(1, OUTPUT_DIM),
                  ((0, 0), (0, OUT_PAD - OUTPUT_DIM)),
                  constant_values=NEG_BIG)   # keep f32: bf16 would overflow

    # Batch tile: multiple of 8 sublanes, capped for VMEM, split into >=2
    # grid steps when there is enough work (v7x megacore).
    if block_b is None:
        block_b = _choose_block_b(B)
    block_b = max(8, _round_up(block_b, 8))
    Bp = _round_up(max(B, 1), block_b)
    if Bp > B:
        x2d = jnp.pad(x2d, ((0, Bp - B), (0, 0)))
    grid = (Bp // block_b,)

    out = pl.pallas_call(
        mnist_kernel,
        out_shape=jax.ShapeDtypeStruct((Bp, OUT_PAD), jnp.float32),
        grid=grid,
        in_specs=[
            # x tile streams over the batch; last dim = full 784.
            pl.BlockSpec((block_b, INPUT_DIM), lambda i: (i, 0)),
            # weights / biases: constant index_map -> VMEM-resident.
            pl.BlockSpec((INPUT_DIM, MID_PAD), lambda i: (0, 0)),
            pl.BlockSpec((1, MID_PAD), lambda i: (0, 0)),
            pl.BlockSpec((MID_PAD, OUT_PAD), lambda i: (0, 0)),
            pl.BlockSpec((1, OUT_PAD), lambda i: (0, 0)),
        ],
        out_specs=pl.BlockSpec((block_b, OUT_PAD), lambda i: (i, 0)),
        compiler_params=pltpu.CompilerParams(
            dimension_semantics=("parallel",)),
    )(x2d, w1p, b1p, w2p, b2p)

    # Slice away batch padding and the padded logit lanes.
    return out[:B, :OUTPUT_DIM]


def mnist_reference(x, w1, b1, w2, b2):
    # Pure-JAX reference (eval-mode dropout = identity).
    x2d = x.reshape(x.shape[0], -1).astype(jnp.float32)
    h = jnp.maximum(x2d @ w1 + b1, 0.0)
    logits = h @ w2 + b2
    return jax.nn.log_softmax(logits, axis=-1)


def init_params(key):
    # Deterministic init mimicking nn.Linear's uniform(-1/sqrt(fan_in), ...).
    k1, k2, k3, k4 = jax.random.split(key, 4)
    bound1 = 1.0 / jnp.sqrt(INPUT_DIM)
    bound2 = 1.0 / jnp.sqrt(MID_DIM)
    # stored transposed: (in_dim, out_dim) so the kernel does x @ W + b
    w1 = jax.random.uniform(k1, (INPUT_DIM, MID_DIM), jnp.float32, -bound1, bound1)
    b1 = jax.random.uniform(k2, (1, MID_DIM), jnp.float32, -bound1, bound1)
    w2 = jax.random.uniform(k3, (MID_DIM, OUTPUT_DIM), jnp.float32, -bound2, bound2)
    b2 = jax.random.uniform(k4, (1, OUTPUT_DIM), jnp.float32, -bound2, bound2)
    return w1, b1, w2, b2


if __name__ == "__main__":
    key = jax.random.PRNGKey(0)
    kx, kp = jax.random.split(key)
    # small MNIST-like batch: (B, C, H, W) = (2, 1, 28, 28) -> flatten -> 784
    x = jax.random.normal(kx, (2, 1, 28, 28), jnp.float32)
    w1, b1, w2, b2 = init_params(kp)

    ref = mnist_reference(x, w1, b1, w2, b2)

    # Default path: bf16 inputs, f32 accumulate (loose tolerance for bf16).
    out_bf16 = jax.block_until_ready(mnist_forward(x, w1, b1, w2, b2))
    assert out_bf16.shape == (2, OUTPUT_DIM)
    assert bool(jnp.all(jnp.abs(out_bf16 - ref) < 1e-1))
    assert bool(jnp.all(jnp.abs(jnp.sum(jnp.exp(out_bf16), axis=-1) - 1.0) < 1e-3))

    # f32 path matches the pure-JAX (PyTorch-equivalent) reference tightly.
    out_f32 = jax.block_until_ready(
        mnist_forward(x, w1, b1, w2, b2, use_bf16=False))
    assert out_f32.shape == (2, OUTPUT_DIM)
    assert bool(jnp.all(jnp.abs(out_f32 - ref) < 1e-4))
    assert bool(jnp.all(jnp.abs(jnp.sum(jnp.exp(out_f32), axis=-1) - 1.0) < 1e-4))

    print("KERNEL_OK")
</pallas_src>

<mosaic_0001>
module attributes {stable_mosaic.version = 11 : i64} {
  func.func @mnist_kernel(%arg0: i32, %arg1: memref<8x784xbf16, #tpu.memory_space<vmem>>, %arg2: memref<784x128xbf16, #tpu.memory_space<vmem>>, %arg3: memref<1x128xf32, #tpu.memory_space<vmem>>, %arg4: memref<128x128xbf16, #tpu.memory_space<vmem>>, %arg5: memref<1x128xf32, #tpu.memory_space<vmem>>, %arg6: memref<8x128xf32, #tpu.memory_space<vmem>>) attributes {dimension_semantics = [#tpu.dimension_semantics<parallel>], iteration_bounds = array<i64: 1>, scalar_prefetch = 0 : i64, scratch_operands = 0 : i64, tpu.core_type = #tpu.core_type<tc>, window_params = [{transform_indices = @transform_0, window_bounds = array<i64: 8, 784>}, {pipeline_mode = #tpu.pipeline_mode<synchronous>, transform_indices = @transform_1, window_bounds = array<i64: 784, 128>}, {pipeline_mode = #tpu.pipeline_mode<synchronous>, transform_indices = @transform_2, window_bounds = array<i64: 1, 128>}, {pipeline_mode = #tpu.pipeline_mode<synchronous>, transform_indices = @transform_3, window_bounds = array<i64: 128, 128>}, {pipeline_mode = #tpu.pipeline_mode<synchronous>, transform_indices = @transform_4, window_bounds = array<i64: 1, 128>}, {transform_indices = @transform_5, window_bounds = array<i64: 8, 128>}]} {
    %c0 = arith.constant 0 : index
    %c0_0 = arith.constant 0 : index
    %0 = vector.load %arg1[%c0, %c0_0] : memref<8x784xbf16, #tpu.memory_space<vmem>>, vector<8x784xbf16>
    %c0_1 = arith.constant 0 : index
    %c0_2 = arith.constant 0 : index
    %1 = vector.load %arg2[%c0_1, %c0_2] : memref<784x128xbf16, #tpu.memory_space<vmem>>, vector<784x128xbf16>
    %cst = arith.constant dense<0.000000e+00> : vector<8x128xf32>
    %2 = tpu.matmul %0, %1, %cst {dimension_numbers = #tpu.dot_dimension_numbers<[1], [0], [0], [1], [0, 0, 1, 1], [], []>} : vector<8x784xbf16>, vector<784x128xbf16>, vector<8x128xf32> -> vector<8x128xf32>
    %c0_3 = arith.constant 0 : index
    %c0_4 = arith.constant 0 : index
    %3 = vector.load %arg3[%c0_3, %c0_4] : memref<1x128xf32, #tpu.memory_space<vmem>>, vector<1x128xf32>
    %4 = vector.broadcast %3 : vector<1x128xf32> to vector<8x128xf32>
    %5 = arith.addf %2, %4 : vector<8x128xf32>
    %cst_5 = arith.constant 0.000000e+00 : f32
    %6 = vector.broadcast %cst_5 : f32 to vector<8x128xf32>
    %7 = arith.maximumf %5, %6 : vector<8x128xf32>
    %8 = arith.truncf %7 : vector<8x128xf32> to vector<8x128xbf16>
    %c0_6 = arith.constant 0 : index
    %c0_7 = arith.constant 0 : index
    %9 = vector.load %arg4[%c0_6, %c0_7] : memref<128x128xbf16, #tpu.memory_space<vmem>>, vector<128x128xbf16>
    %cst_8 = arith.constant dense<0.000000e+00> : vector<8x128xf32>
    %10 = tpu.matmul %8, %9, %cst_8 {dimension_numbers = #tpu.dot_dimension_numbers<[1], [0], [0], [1], [0, 0, 1, 1], [], []>} : vector<8x128xbf16>, vector<128x128xbf16>, vector<8x128xf32> -> vector<8x128xf32>
    %c0_9 = arith.constant 0 : index
    %c0_10 = arith.constant 0 : index
    %11 = vector.load %arg5[%c0_9, %c0_10] : memref<1x128xf32, #tpu.memory_space<vmem>>, vector<1x128xf32>
    %12 = vector.broadcast %11 : vector<1x128xf32> to vector<8x128xf32>
    %13 = arith.addf %10, %12 : vector<8x128xf32>
    %cst_11 = arith.constant dense<0xFF800000> : vector<8xf32>
    %14 = vector.multi_reduction <maximumf>, %13, %cst_11 [1] : vector<8x128xf32> to vector<8xf32>
    %15 = vector.shape_cast %14 : vector<8xf32> to vector<8x1xf32>
    %16 = vector.broadcast %15 : vector<8x1xf32> to vector<8x128xf32>
    %17 = arith.subf %13, %16 : vector<8x128xf32>
    %18 = math.exp %17 : vector<8x128xf32>
    %cst_12 = arith.constant dense<0.000000e+00> : vector<8xf32>
    %19 = vector.multi_reduction <add>, %18, %cst_12 [1] : vector<8x128xf32> to vector<8xf32>
    %20 = vector.shape_cast %19 : vector<8xf32> to vector<8x1xf32>
    %21 = math.log %20 : vector<8x1xf32>
    %22 = vector.broadcast %21 : vector<8x1xf32> to vector<8x128xf32>
    %23 = arith.subf %17, %22 : vector<8x128xf32>
    %c0_13 = arith.constant 0 : index
    %c0_14 = arith.constant 0 : index
    %24 = vector.load %arg6[%c0_13, %c0_14] : memref<8x128xf32, #tpu.memory_space<vmem>>, vector<8x128xf32>
    tpu.vector_store %arg6[%c0_13, %c0_14], %23 {strides = array<i32>} : memref<8x128xf32, #tpu.memory_space<vmem>>, vector<8x128xf32>,
    return
  }
  func.func @transform_0(%arg0: i32) -> (i32, i32) {
    %c0_i32 = arith.constant 0 : i32
    %c0_i32_0 = arith.constant 0 : i32
    return %arg0, %c0_i32 : i32, i32
  }
  func.func @transform_1(%arg0: i32) -> (i32, i32) {
    %c0_i32 = arith.constant 0 : i32
    %c0_i32_0 = arith.constant 0 : i32
    %c0_i32_1 = arith.constant 0 : i32
    return %c0_i32, %c0_i32_0 : i32, i32
  }
  func.func @transform_2(%arg0: i32) -> (i32, i32) {
    %c0_i32 = arith.constant 0 : i32
    %c0_i32_0 = arith.constant 0 : i32
    %c0_i32_1 = arith.constant 0 : i32
    return %c0_i32, %c0_i32_0 : i32, i32
  }
  func.func @transform_3(%arg0: i32) -> (i32, i32) {
    %c0_i32 = arith.constant 0 : i32
    %c0_i32_0 = arith.constant 0 : i32
    %c0_i32_1 = arith.constant 0 : i32
    return %c0_i32, %c0_i32_0 : i32, i32
  }
  func.func @transform_4(%arg0: i32) -> (i32, i32) {
    %c0_i32 = arith.constant 0 : i32
    %c0_i32_0 = arith.constant 0 : i32
    %c0_i32_1 = arith.constant 0 : i32
    return %c0_i32, %c0_i32_0 : i32, i32
  }
  func.func @transform_5(%arg0: i32) -> (i32, i32) {
    %c0_i32 = arith.constant 0 : i32
    %c0_i32_0 = arith.constant 0 : i32
    return %arg0, %c0_i32 : i32, i32
  }
}

</mosaic_0001>

<bundles_post_ra>
// kernel: tpu_custom_call.1
= control target key start
LH: loop header
LB: loop body
LE: loop exit
PB: predicated region body
PF: predicated region fallthrough
CT: control target
= control target key end

     0   :  { %10 = vsyncpa [#allocation3], 0  ;;  %s1152_s0 = inlined_call_operand.hbm [shape: bf16[8,784], index: 0, kind: input, shape index: {}]   ;;  %s1153_s1 = inlined_call_operand.hbm [shape: bf16[784,128], index: 1, kind: input, shape index: {}]   ;;  %s1154_s2 = inlined_call_operand.vmem [shape: f32[1,128], index: 2, kind: input, shape index: {}]   ;;  %s1155_s3 = inlined_call_operand.hbm [shape: bf16[128,128], index: 3, kind: input, shape index: {}]   ;;  %s1156_s4 = inlined_call_operand.vmem [shape: f32[1,128], index: 4, kind: input, shape index: {}]   ;;  %s1157_s5 = inlined_call_operand.hbm [shape: f32[8,128], index: 5, kind: output, shape index: {}]  }
   0x1   :  { %11 = vsyncpa [#allocation6], 0  ;;  %s28_s20 = sshll.u32 %s1153_s1, 4  ;;  %s29_s20 = int_to_ptr.hbm [resolvable:$true] %s28_s20 }
   0x2   :  { %12 = vsyncpa [#allocation4], 0  ;;  %s1098_s21 = smov [#allocation5]   ;;  %s18_s25 = sshll.u32 %s1152_s0, 4  ;;  %s19_s25 = int_to_ptr.hbm [resolvable:$true] %s18_s25 }
   0x3   :  { %s30_s22 = sshll.u32 %s1098_s21, 4  ;;  %s1099_s26 = smov 64   ;;  %s31_s22 = int_to_ptr.vmem [resolvable:$true] %s30_s22 }
   0x4   :  { %s1100_s27 = smov 4   ;;  %s1101_s28 = smov [#allocation2]  }
   0x5   :  { %36 = dma.hbm_to_vmem [thread:$0]  %s29_s20, 6272, %s31_s22, [#allocation6], %s1099_s26, %s1099_s26, %s1100_s27  }
   0x6   :  { %s20_s29 = sshll.u32 %s1101_s28, 4  ;;  %s43_s7 = sshll.u32 %s1155_s3, 4  ;;  %s21_s29 = int_to_ptr.vmem [resolvable:$true] %s20_s29  ;;  %s44_s7 = int_to_ptr.hbm [resolvable:$true] %s43_s7 }
   0x7   :  { %23 = dma.hbm_to_vmem [thread:$0]  %s19_s25, 448, %s21_s29, [#allocation3]  }
   0x8   :  { %s1102_s1 = smov [#allocation7]  }
   0x9   :  { %s45_s8 = sshll.u32 %s1102_s1, 4  ;;  %s46_s8 = int_to_ptr.vmem [resolvable:$true] %s45_s8 }
   0xa   :  { %51 = dma.hbm_to_vmem [thread:$0]  %s44_s7, 1024, %s46_s8, [#allocation6], %s1099_s26, %s1099_s26, %s1100_s27  }
   0xb   :  { %1092 = dma.done.wait [#allocation3], 448  }
   0xc   :  { %1093 = vsyncadd [#allocation3], 4294966848 }
   0xd   :  { %1094 = dma.done.wait [#allocation6], 7296  }
   0xe   :  { %1095 = vsyncadd [#allocation6], 4294960000  ;;  %v934_v0 = vld [vmem:[#allocation5 + $0x38] sm:$0xff]  ;;  %v933_v3 = vld [vmem:[#allocation5 + $0x30] sm:$0xff]  ;;  %vm491_vm0 = vcmask 130048   ;;  %s1103_s10 = smov [#allocation8]  }
   0xf   :  { %v942_v1 = vld [vmem:[#allocation5 + $0x78] sm:$0xff]  ;;  %495 = vmatpush.bf16.msra.mxu0 %v934_v0  ;;  %v941_v4 = vld [vmem:[#allocation5 + $0x70] sm:$0xff]  ;;  %v932_v8 = vld [vmem:[#allocation5 + $0x28] sm:$0xff]  ;;  %s685_s11 = sshll.u32 %s1103_s10, 4  ;;  %s687_s14 = sshll.u32 %s1157_s5, 4  ;;  %s686_s11 = int_to_ptr.vmem [resolvable:$true] %s685_s11  ;;  %s688_s14 = int_to_ptr.hbm [resolvable:$true] %s687_s14 }
  0x10   :  { %v950_v2 = vld [vmem:[#allocation5 + $0xb8] sm:$0xff]  ;;  %508 = vmatpush.bf16.msra.mxu1 %v942_v1  ;;  %v949_v5 = vld [vmem:[#allocation5 + $0xb0] sm:$0xff]  ;;  %v940_v9 = vld [vmem:[#allocation5 + $0x68] sm:$0xff] }
  0x11   :  { %521 = vmatpush.bf16.msra.mxu2 %v950_v2  ;;  %v958_v6 = vld [vmem:[#allocation5 + $0xf8] sm:$0xff]  ;;  %v957_v7 = vld [vmem:[#allocation5 + $0xf0] sm:$0xff]  ;;  %v948_v10 = vld [vmem:[#allocation5 + $0xa8] sm:$0xff] }
  0x12   :  { %534 = vmatpush.bf16.msra.mxu3 %v958_v6  ;;  %v956_v11 = vld [vmem:[#allocation5 + $0xe8] sm:$0xff]  ;;  %v931_v12 = vld [vmem:[#allocation5 + $0x20] sm:$0xff]  ;;  %v930_v16 = vld [vmem:[#allocation5 + $0x18] sm:$0xff] }
  0x13   :  { %496 = vmatpush.bf16.msra.mxu0 %v933_v3  ;;  %v939_v13 = vld [vmem:[#allocation5 + $0x60] sm:$0xff]  ;;  %v938_v17 = vld [vmem:[#allocation5 + $0x58] sm:$0xff]  ;;  %v929_v20 = vld [vmem:[#allocation5 + $0x10] sm:$0xff] }
  0x14   :  { %509 = vmatpush.bf16.msra.mxu1 %v941_v4  ;;  %v947_v14 = vld [vmem:[#allocation5 + $0xa0] sm:$0xff]  ;;  %v946_v18 = vld [vmem:[#allocation5 + $0x98] sm:$0xff]  ;;  %v937_v21 = vld [vmem:[#allocation5 + $0x50] sm:$0xff] }
  0x15   :  { %522 = vmatpush.bf16.msra.mxu2 %v949_v5  ;;  %v955_v15 = vld [vmem:[#allocation5 + $0xe0] sm:$0xff]  ;;  %v954_v19 = vld [vmem:[#allocation5 + $0xd8] sm:$0xff]  ;;  %v945_v22 = vld [vmem:[#allocation5 + $0x90] sm:$0xff] }
  0x16   :  { %535 = vmatpush.bf16.msra.mxu3 %v957_v7  ;;  %v953_v23 = vld [vmem:[#allocation5 + $0xd0] sm:$0xff]  ;;  %v928_v24 = vld [vmem:[#allocation5 + $0x8] sm:$0xff]  ;;  %v927_v32 = vld [vmem:[#allocation5] sm:$0xff] }
  0x17   :  { %497 = vmatpush.bf16.msra.mxu0 %v932_v8  ;;  %v936_v25 = vld [vmem:[#allocation5 + $0x48] sm:$0xff]  ;;  %v935_v33 = vld [vmem:[#allocation5 + $0x40] sm:$0xff]  ;;  %v966_v34 = vld [vmem:[#allocation5 + $0x138] sm:$0xff] }
  0x18   :  { %510 = vmatpush.bf16.msra.mxu1 %v940_v9  ;;  %v67_v26 = vld [vmem:[#allocation2] sm:$0xff]  ;;  %v68_v28 = vld [vmem:[#allocation2 + $0x8] sm:$0xff]  ;;  %v974_v35 = vld [vmem:[#allocation5 + $0x178] sm:$0xff] }
  0x19   :  { %523 = vmatpush.bf16.msra.mxu2 %v948_v10  ;;  %v944_v27 = vld [vmem:[#allocation5 + $0x88] sm:$0xff]  ;;  %v177_v29 = vunpack.c.l.b16 %v67_v26  ;;  %v178_v31 = vunpack.c.h.b16 %v67_v26  ;;  %v943_v36 = vld [vmem:[#allocation5 + $0x80] sm:$0xff]  ;;  %v179_v37 = vunpack.c.l.b16 %v68_v28  ;;  %v180_v40 = vunpack.c.h.b16 %v68_v28  ;;  %v965_v43 = vld [vmem:[#allocation5 + $0x130] sm:$0xff] }
  0x1a   :  { %536 = vmatpush.bf16.msra.mxu3 %v956_v11  ;;  %v952_v30 = vld [vmem:[#allocation5 + $0xc8] sm:$0xff]  ;;  %v951_v41 = vld [vmem:[#allocation5 + $0xc0] sm:$0xff]  ;;  %v973_v44 = vld [vmem:[#allocation5 + $0x170] sm:$0xff] }
  0x1b   :  { %498 = vmatpush.bf16.msra.mxu0 %v931_v12  ;;  %v184_v38 = vpack.c.b16 %v177_v29, %v177_v29  ;;  %v185_v39 = vpack.c.b16 %v178_v31, %v178_v31  ;;  %v975_v42 = vld [vmem:[#allocation5 + $0x180] sm:$0xff]  ;;  %v186_v45 = vpack.c.b16 %v179_v37, %v179_v37  ;;  %v187_v46 = vpack.c.b16 %v180_v40, %v180_v40  ;;  %v964_v47 = vld [vmem:[#allocation5 + $0x128] sm:$0xff]  ;;  %v70_v51 = vld [vmem:[#allocation2 + $0x18] sm:$0xf] }
  0x1c   :  { %511 = vmatpush.bf16.msra.mxu1 %v939_v13  ;;  %v972_v48 = vld [vmem:[#allocation5 + $0x168] sm:$0xff]  ;;  %v963_v49 = vld [vmem:[#allocation5 + $0x120] sm:$0xff]  ;;  %v962_v52 = vld [vmem:[#allocation5 + $0x118] sm:$0xff]  ;;  %v183_v54 = vunpack.c.l.b16 %v70_v51 }
  0x1d   :  { %524 = vmatpush.bf16.msra.mxu2 %v947_v14  ;;  %v971_v50 = vld [vmem:[#allocation5 + $0x160] sm:$0xff]  ;;  %v970_v53 = vld [vmem:[#allocation5 + $0x158] sm:$0xff]  ;;  %v961_v55 = vld [vmem:[#allocation5 + $0x110] sm:$0xff] }
  0x1e   :  { %537 = vmatpush.bf16.msra.mxu3 %v955_v15  ;;  %v969_v56 = vld [vmem:[#allocation5 + $0x150] sm:$0xff]  ;;  %v190_v57 = vpack.c.b16 %v183_v54, %v183_v54  ;;  %v960_v58 = vld [vmem:[#allocation5 + $0x108] sm:$0xff]  ;;  %v959_v63 = vld [vmem:[#allocation5 + $0x100] sm:$0xff] }
  0x1f   :  { %499 = vmatpush.bf16.msra.mxu0 %v930_v16  ;;  %v968_v59 = vld [vmem:[#allocation5 + $0x148] sm:$0xff]  ;;  %v69_v60 = vld [vmem:[#allocation2 + $0x10] sm:$0xff]  ;;  %v967_v0 = vld [vmem:[#allocation5 + $0x140] sm:$0xff] }
  0x20   :  { %512 = vmatpush.bf16.msra.mxu1 %v938_v17  ;;  %v181_v61 = vunpack.c.l.b16 %v69_v60  ;;  %v182_v62 = vunpack.c.h.b16 %v69_v60  ;;  %v983_v3 = vld [vmem:[#allocation7 + $0x38] sm:$0xff]  ;;  %v982_v4 = vld [vmem:[#allocation7 + $0x30] sm:$0xff]  ;;  %v981_v5 = vld [vmem:[#allocation7 + $0x28] sm:$0xff] }
  0x21   :  { %525 = vmatpush.bf16.msra.mxu2 %v946_v18  ;;  %v980_v6 = vld [vmem:[#allocation7 + $0x20] sm:$0xff]  ;;  %v979_v7 = vld [vmem:[#allocation7 + $0x18] sm:$0xff]  ;;  %v978_v8 = vld [vmem:[#allocation7 + $0x10] sm:$0xff] }
  0x22   :  { %538 = vmatpush.bf16.msra.mxu3 %v954_v19  ;;  %v188_v1 = vpack.c.b16 %v181_v61, %v181_v61  ;;  %v189_v2 = vpack.c.b16 %v182_v62, %v182_v62  ;;  %v977_v9 = vld [vmem:[#allocation7 + $0x8] sm:$0xff]  ;;  %v976_v12 = vld [vmem:[#allocation7] sm:$0xff]  ;;  %v990_v17 = vld [vmem:[%s1154_s2] ss:$0 sm:$0xff] }
  0x23   :  { %500 = vmatpush.bf16.msra.mxu0 %v929_v20 }
  0x24   :  { %513 = vmatpush.bf16.msra.mxu1 %v937_v21 }
  0x25   :  { %526 = vmatpush.bf16.msra.mxu2 %v945_v22 }
  0x26   :  { %539 = vmatpush.bf16.msra.mxu3 %v953_v23 }
  0x27   :  { %501 = vmatpush.bf16.msra.mxu0 %v928_v24 }
  0x28   :  { %514 = vmatpush.bf16.msra.mxu1 %v936_v25 }
  0x29   :  { %527 = vmatpush.bf16.msra.mxu2 %v944_v27 }
  0x2a   :  { %540 = vmatpush.bf16.msra.mxu3 %v952_v30 }
  0x2b   :  { %502 = vmatpush.bf16.msra.mxu0 %v927_v32 }
  0x2c   :  { %515 = vmatpush.bf16.msra.mxu1 %v935_v33 }
  0x2d   :  { %528 = vmatpush.bf16.msra.mxu2 %v943_v36 }
  0x2e   :  { %503 = vmatmul.bf16.vlgmr.msra.gmra.mxu0 %v184_v38  ;;  %541 = vmatpush.bf16.msra.mxu3 %v951_v41 }
  0x2f   :  { %547 = vmatpush.bf16.msrb.mxu0 %v966_v34  ;;  %516 = vmatmul.bf16.vlgmr.msra.gmra.mxu1 %v185_v39 }
  0x30   :  { %560 = vmatpush.bf16.msrb.mxu1 %v974_v35  ;;  %529 = vmatmul.bf16.vlgmr.msra.gmra.mxu2 %v186_v45  ;;  %v991_v35 = vld [vmem:[%s1156_s4] ss:$0 sm:$0xff] }
  0x31   :  { %580 = vmatpush.bf16.msrb.mxu2 %v975_v42  ;;  %542 = vmatmul.bf16.vlgmr.msra.gmra.mxu3 %v187_v46 }
  0x32   :  { %656 = vmatpush.bf16.msrb.mxu3 %v983_v3 }
  0x33   :  { %548 = vmatpush.bf16.msrb.mxu0 %v965_v43 }
  0x34   :  { %561 = vmatpush.bf16.msrb.mxu1 %v973_v44 }
  0x36   :  { %657 = vmatpush.bf16.msrb.mxu3 %v982_v4 }
  0x37   :  { %549 = vmatpush.bf16.msrb.mxu0 %v964_v47 }
  0x38   :  { %562 = vmatpush.bf16.msrb.mxu1 %v972_v48 }
  0x3a   :  { %658 = vmatpush.bf16.msrb.mxu3 %v981_v5 }
  0x3b   :  { %550 = vmatpush.bf16.msrb.mxu0 %v963_v49 }
  0x3c   :  { %563 = vmatpush.bf16.msrb.mxu1 %v971_v50 }
  0x3e   :  { %659 = vmatpush.bf16.msrb.mxu3 %v980_v6 }
  0x3f   :  { %551 = vmatpush.bf16.msrb.mxu0 %v962_v52 }
  0x40   :  { %564 = vmatpush.bf16.msrb.mxu1 %v970_v53  ;;  %894 = vmatmul.msk.bf16.vlgmr.msrb.gmra.mxu2 %vm491_vm0, %v190_v57 }
  0x42   :  { %660 = vmatpush.bf16.msrb.mxu3 %v979_v7 }
  0x43   :  { %552 = vmatpush.bf16.msrb.mxu0 %v961_v55 }
  0x44   :  { %565 = vmatpush.bf16.msrb.mxu1 %v969_v56 }
  0x46   :  { %661 = vmatpush.bf16.msrb.mxu3 %v978_v8 }
  0x47   :  { %553 = vmatpush.bf16.msrb.mxu0 %v960_v58 }
  0x48   :  { %566 = vmatpush.bf16.msrb.mxu1 %v968_v59 }
  0x4a   :  { %662 = vmatpush.bf16.msrb.mxu3 %v977_v9 }
  0x4b   :  { %554 = vmatpush.bf16.msrb.mxu0 %v959_v63 }
  0x4c   :  { %567 = vmatpush.bf16.msrb.mxu1 %v967_v0 }
  0x4e   :  { %555 = vmatmul.bf16.vlgmr.msrb.gmra.mxu0 %v188_v1  ;;  %663 = vmatpush.bf16.msrb.mxu3 %v976_v12 }
  0x4f   :  { %568 = vmatmul.bf16.vlgmr.msrb.gmra.mxu1 %v189_v2 }
  0xab   :  { %v504_v10 = vpop.f32.mrf.mxu0 }
  0xac   :  { %v517_v11 = vpop.f32.mrf.mxu1  ;;  %v505_v18 = vadd.f32 %v990_v17, %v504_v10 }
  0xae   :  { %v518_v21 = vadd.f32 %v517_v11, %v505_v18 }
  0xb3   :  { %v506_v13 = vpop.f32.mrf.mxu0  ;;  %v530_v15 = vpop.f32.mrf.mxu2 }
  0xb4   :  { %v519_v14 = vpop.f32.mrf.mxu1  ;;  %v543_v16 = vpop.f32.mrf.mxu3  ;;  %v531_v22 = vadd.f32 %v530_v15, %v518_v21 }
  0xb6   :  { %v544_v24 = vadd.f32 %v543_v16, %v531_v22 }
  0xbb   :  { %v532_v19 = vpop.f32.mrf.mxu2 }
  0xbc   :  { %v545_v20 = vpop.f32.mrf.mxu3 }
  0xc3   :  { %v582_v23 = vpop.f32.mrf.mxu2 }
  0xcb   :  { %v556_v25 = vpop.f32.mrf.mxu0  ;;  %v584_v29 = vpop.f32.mrf.mxu2 }
  0xcc   :  { %v569_v26 = vpop.f32.mrf.mxu1  ;;  %v557_v27 = vadd.f32 %v556_v25, %v544_v24 }
  0xce   :  { %v570_v28 = vadd.f32 %v569_v26, %v557_v27 }
  0xd0   :  { %v583_v30 = vadd.f32 %v582_v23, %v570_v28 }
  0xd2   :  { %v586_v31 = vmax.f32 %v583_v30, 0.0 }
  0xd3   :  { %v558_v32 = vpop.f32.mrf.mxu0 }
  0xd4   :  { %v571_v33 = vpop.f32.mrf.mxu1  ;;  %v587_v34 = vpack.c.bf16 %v586_v31, %v586_v31 }
  0xd6   :  { %664 = vmatmul.bf16.vlgmr.msrb.gmra.mxu3 %v587_v34 }
 0x159   :  { %v665_v36 = vpop.f32.mrf.mxu3 }
 0x15a   :  { %v666_v37 = vadd.f32 %v991_v35, %v665_v36 }
 0x15c   :  { %669 = vmax.xlane.f32.xlu0 %v666_v37 }
 0x161   :  { %v667_v38 = vpop.f32.mrf.mxu3 }
 0x1cf   :  { %v670_v39 = vpop.xlane.xlu0 %669 }
 0x1d0   :  { %v671_v40 = vsub.f32 %v666_v37, %v670_v39 }
 0x1d2   :  { %v672_v41 = vmul.f32 1.442695, %v671_v40 }
 0x1d4   :  { %992 = vpow2.f32 %v672_v41 }
 0x1da   :  { %v993_v42 = vpop.eup %992 }
 0x1db   :  { %674 = vadd.xlane.f32.xlu0 %v993_v42 }
 0x24e   :  { %v675_v43 = vpop.xlane.xlu0 %674 }
 0x24f   :  { %994 = vlog2.f32 %v675_v43 }
 0x255   :  { %v995_v44 = vpop.eup %994 }
 0x256   :  { %v677_v45 = vmul.f32 0.6931472, %v995_v44 }
 0x258   :  { %v678_v46 = vsub.f32 %v671_v40, %v677_v45 }
 0x25a   :  { %679 = vst [vmem:[#allocation8] sm:$0xff] %v678_v46 }
 0x25b   :  { %690 = dma.vmem_to_hbm [thread:$0]  %s686_s11, 128, %s688_s14, [#allocation4]  }
 0x25c   :  { %1096 = dma.done.wait [#allocation4], 128  }
 0x25d   :  { %1097 = vsyncadd [#allocation4], 4294967168 }
 0x25e   :  { %695 = vsyncpa [#allocation3], 1 }
 0x25f   :  { %696 = vsyncpa [#allocation6], 1 }
 0x260   :  { %697 = vsyncpa [#allocation4], 1 }

</bundles_post_ra>
